<compile_context>
chip_gen: v7x
topology: tpu7x:2x2x1
jax: 0.10.0
libtpu: 0.0.40
codegen_flags: <defaults>
</compile_context>

<pallas_src>
import functools

import jax
import jax.numpy as jnp
from jax.experimental import pallas as pl
from jax.experimental.pallas import tpu as pltpu

_LANE = 128


def _round_up(n, m):
    return ((n + m - 1) // m) * m


# ---------------------------------------------------------------------------
# Kernel
# ---------------------------------------------------------------------------
def env_predictor_kernel(x_ref, w1_ref, b1_ref, w2_ref, b2_ref, out_ref,
                         *, cosine):
    """Fused bottleneck + ReLU (+ optional L2 normalize) + fc.

    env column and 1/temp are pre-folded into b1_ref / (w2_ref, b2_ref).
    x arrives in f32 and is cast to bf16 in-kernel (free VPU slot); the fc
    matmul and all post-matmul elementwise math stay in f32.
    """
    x = x_ref[...].astype(w1_ref.dtype)                       # f32 -> bf16 (VPU)

    # bottleneck: (TB, F) @ (F, H), bf16 inputs, f32 accumulate on the MXU.
    h = jnp.dot(x, w1_ref[...], preferred_element_type=jnp.float32)
    h = jnp.maximum(h + b1_ref[...], jnp.float32(0.0))        # bias + ReLU (f32)

    if cosine:
        # F.normalize(h, p=2, dim=1): rsqrt rides the EUP slot, the cross-lane
        # sum the XLU slot; no VALU divide.
        sq = jnp.sum(h * h, axis=-1, keepdims=True)
        h = h * jax.lax.rsqrt(jnp.maximum(sq, jnp.float32(1e-24)))

    # fc: (TB, H) @ (H, C_pad) in pure f32 (temp folded into w2/b2; output
    # lanes zero-padded to 128 -> unmasked, lane-dense stores).
    logits = jnp.dot(h, w2_ref[...], preferred_element_type=jnp.float32)
    out_ref[...] = logits + b2_ref[...]


# ---------------------------------------------------------------------------
# Param prep (one-time, hoisted out of the per-call path)
# ---------------------------------------------------------------------------
def prepare_params(w1_t, b1, w2_t, b2, *, env_val, temp,
                   compute_dtype=jnp.bfloat16):
    """Fold env column + 1/temp into the parameters; cast/pad for the kernel.

    w1_t: (F+1, H) transposed bottleneck weight (PyTorch weight is (H, F+1))
    b1:   (H,)
    w2_t: (H, C)   transposed fc weight
    b2:   (C,)
    env_val: 0.0 ('src') or 1.0 ('tgt') — uniform per call in the module.
    """
    F = w1_t.shape[0] - 1
    H = w1_t.shape[1]
    C = w2_t.shape[1]

    w1x = w1_t[:F, :].astype(compute_dtype)                    # (F, H) bf16
    w1_env = w1_t[F, :].astype(jnp.float32)                    # (H,)
    b1_eff = (b1.astype(jnp.float32)
              + jnp.float32(env_val) * w1_env).reshape(1, H)   # (1, H) f32

    inv_t = jnp.float32(1.0 / float(temp))
    c_pad = _round_up(C, _LANE)
    # fc stays f32 (accuracy of the cosine head); pad output lanes to 128 so
    # the kernel's final store is lane-dense / unmasked.
    w2s = jnp.zeros((H, c_pad), jnp.float32)
    w2s = w2s.at[:, :C].set(w2_t.astype(jnp.float32) * inv_t)  # (H, C_pad) f32
    b2s = jnp.zeros((1, c_pad), jnp.float32)
    b2s = b2s.at[0, :C].set(b2.astype(jnp.float32) * inv_t)    # (1, C_pad) f32
    return w1x, b1_eff, w2s, b2s


def _pick_tile_b(B, f_lanes, h_lanes, c_lanes,
                 vmem_budget_bytes=16 * 1024 * 1024, cap=8192):
    """Largest 8-aligned batch tile that fits the VMEM budget.

    Also caps the tile at round_up(B/2, 8) so there are >=2 grid steps
    whenever B > 8, letting dimension_semantics=("parallel",) shard the batch
    across v7x's two TensorCores (no-op on single-TC v5e/v6e).
    """
    # per-row VMEM bytes: f32 x tile (double-buffered) + f32 lane-padded out
    # tile (double-buffered) + ~3 live f32 copies of the (tile_b, H)
    # intermediate (h + ReLU/normalize temporaries).
    per_row = 4 * (2 * f_lanes + 2 * c_lanes + 3 * h_lanes)
    fit = max(8, (vmem_budget_bytes // per_row) // 8 * 8)
    half = 8 * pl.cdiv(pl.cdiv(B, 2), 8)
    return int(max(8, min(cap, fit, half)))


# ---------------------------------------------------------------------------
# Forward wrapper
# ---------------------------------------------------------------------------
@functools.partial(jax.jit, static_argnames=("num_class", "cosine"))
def env_predictor_forward(x, params, *, num_class, cosine=False):
    """x: (B, F) float32. params: output of prepare_params. Returns (B, C) f32."""
    w1x, b1_eff, w2s, b2s = params
    B, F = x.shape
    H = w1x.shape[1]
    C_pad = w2s.shape[1]

    f_lanes = _round_up(F, _LANE)
    h_lanes = _round_up(H, _LANE)
    tile_b = _pick_tile_b(B, f_lanes, h_lanes, C_pad)
    grid = (pl.cdiv(B, tile_b),)          # ragged B handled by partial last block

    kernel = functools.partial(env_predictor_kernel, cosine=bool(cosine))

    cost = pl.CostEstimate(
        flops=2 * B * (F * H + H * C_pad),
        transcendentals=B if cosine else 0,
        bytes_accessed=(x.size * x.dtype.itemsize
                        + w1x.size * 2 + b1_eff.size * 4
                        + w2s.size * 4 + b2s.size * 4
                        + B * C_pad * 4),
    )

    out = pl.pallas_call(
        kernel,
        out_shape=jax.ShapeDtypeStruct((B, C_pad), jnp.float32),
        grid=grid,
        in_specs=[
            pl.BlockSpec((tile_b, F), lambda i: (i, 0)),   # x: tiled over batch (f32)
            pl.BlockSpec((F, H), lambda i: (0, 0)),        # weights stay VMEM-resident
            pl.BlockSpec((1, H), lambda i: (0, 0)),
            pl.BlockSpec((H, C_pad), lambda i: (0, 0)),
            pl.BlockSpec((1, C_pad), lambda i: (0, 0)),
        ],
        out_specs=pl.BlockSpec((tile_b, C_pad), lambda i: (i, 0)),
        compiler_params=pltpu.CompilerParams(
            dimension_semantics=("parallel",),             # v7x: shard batch over 2 TCs
            vmem_limit_bytes=48 * 1024 * 1024),            # guardrail (< v7x 64 MiB)
        cost_estimate=cost,
    )(x, w1x, b1_eff, w2s, b2s)

    return out[:, :num_class]


# ---------------------------------------------------------------------------
# Synthetic params / demo
# ---------------------------------------------------------------------------
def make_params(key, in_features, bottleneck_dim, num_class):
    """Deterministic synthetic init (stand-in for init_weights in the repo)."""
    k1, k2, k3, k4 = jax.random.split(key, 4)
    # PyTorch Linear weight is (out, in); we store the transpose (in, out).
    w1_t = jax.random.normal(k1, (in_features + 1, bottleneck_dim),
                             jnp.float32) * 0.02
    b1 = jax.random.normal(k2, (bottleneck_dim,), jnp.float32) * 0.01
    w2_t = jax.random.normal(k3, (bottleneck_dim, num_class),
                             jnp.float32) * 0.02
    b2 = jax.random.normal(k4, (num_class,), jnp.float32) * 0.01
    return w1_t, b1, w2_t, b2


if __name__ == "__main__":
    # small shapes consistent with the module
    batch_size = 8
    in_features = 31        # -> 32 after the env-embedding concat in the reference
    bottleneck_dim = 128
    num_class = 16

    key = jax.random.PRNGKey(0)
    kx, kp = jax.random.split(key)

    x = jax.random.normal(kx, (batch_size, in_features), jnp.float32)
    w1_t, b1, w2_t, b2 = make_params(kp, in_features, bottleneck_dim, num_class)

    # env_embedding: 'src' -> 0.0, 'tgt' -> 1.0 (uniform column per call).
    params_src = prepare_params(w1_t, b1, w2_t, b2, env_val=0.0, temp=1.0)
    params_tgt = prepare_params(w1_t, b1, w2_t, b2, env_val=1.0, temp=2.0)

    logits_src = env_predictor_forward(x, params_src, num_class=num_class,
                                       cosine=False)
    logits_tgt_cos = env_predictor_forward(x, params_tgt, num_class=num_class,
                                           cosine=True)
    jax.block_until_ready(logits_src)
    jax.block_until_ready(logits_tgt_cos)

    # --- check 1: kernel vs. same-precision JAX reference (tight) ------------
    def ref_prepared(x, params, cosine):
        w1x, b1_eff, w2s, b2s = params
        xc = x.astype(w1x.dtype)
        h = jnp.maximum(
            jnp.dot(xc, w1x, preferred_element_type=jnp.float32) + b1_eff, 0.0)
        if cosine:
            sq = jnp.sum(h * h, axis=1, keepdims=True)
            h = h * jax.lax.rsqrt(jnp.maximum(sq, 1e-24))
        full = jnp.dot(h, w2s, preferred_element_type=jnp.float32) + b2s
        return full[:, :num_class]

    rp1 = ref_prepared(x, params_src, False)
    rp2 = ref_prepared(x, params_tgt, True)
    assert jnp.allclose(logits_src, rp1, atol=1e-4, rtol=1e-3)
    assert jnp.allclose(logits_tgt_cos, rp2, atol=1e-4, rtol=1e-3)

    # --- check 2: vs. full-f32 PyTorch-eval-faithful reference (loose, bf16) -
    def ref_f32(x, env_val, temp, cosine):
        env_col = jnp.full((x.shape[0], 1), env_val, jnp.float32)
        x1 = jnp.concatenate([x, env_col], axis=1)
        h = jnp.maximum(x1 @ w1_t + b1, 0.0)
        if cosine:
            n = jnp.sqrt(jnp.sum(h * h, axis=1, keepdims=True))
            h = h / jnp.maximum(n, 1e-12)
        return (h @ w2_t + b2) / temp

    rf1 = ref_f32(x, 0.0, 1.0, False)
    rf2 = ref_f32(x, 1.0, 2.0, True)
    assert jnp.allclose(logits_src, rf1, atol=5e-4, rtol=5e-2)
    assert jnp.allclose(logits_tgt_cos, rf2, atol=5e-4, rtol=5e-2)
    assert logits_src.shape == (batch_size, num_class)
    assert logits_tgt_cos.shape == (batch_size, num_class)

    print("KERNEL_OK")
</pallas_src>

<mosaic_0001>
module attributes {stable_mosaic.version = 11 : i64} {
  func.func @env_predictor_kernel(%arg0: i32, %arg1: memref<8x31xf32, #tpu.memory_space<vmem>>, %arg2: memref<31x128xbf16, #tpu.memory_space<vmem>>, %arg3: memref<1x128xf32, #tpu.memory_space<vmem>>, %arg4: memref<128x128xf32, #tpu.memory_space<vmem>>, %arg5: memref<1x128xf32, #tpu.memory_space<vmem>>, %arg6: memref<8x128xf32, #tpu.memory_space<vmem>>) attributes {dimension_semantics = [#tpu.dimension_semantics<parallel>], iteration_bounds = array<i64: 1>, scalar_prefetch = 0 : i64, scratch_operands = 0 : i64, tpu.core_type = #tpu.core_type<tc>, window_params = [{transform_indices = @transform_0, window_bounds = array<i64: 8, 31>}, {pipeline_mode = #tpu.pipeline_mode<synchronous>, transform_indices = @transform_1, window_bounds = array<i64: 31, 128>}, {pipeline_mode = #tpu.pipeline_mode<synchronous>, transform_indices = @transform_2, window_bounds = array<i64: 1, 128>}, {pipeline_mode = #tpu.pipeline_mode<synchronous>, transform_indices = @transform_3, window_bounds = array<i64: 128, 128>}, {pipeline_mode = #tpu.pipeline_mode<synchronous>, transform_indices = @transform_4, window_bounds = array<i64: 1, 128>}, {transform_indices = @transform_5, window_bounds = array<i64: 8, 128>}]} {
    %c0 = arith.constant 0 : index
    %c0_0 = arith.constant 0 : index
    %0 = vector.load %arg1[%c0, %c0_0] : memref<8x31xf32, #tpu.memory_space<vmem>>, vector<8x31xf32>
    %1 = arith.truncf %0 : vector<8x31xf32> to vector<8x31xbf16>
    %c0_1 = arith.constant 0 : index
    %c0_2 = arith.constant 0 : index
    %2 = vector.load %arg2[%c0_1, %c0_2] : memref<31x128xbf16, #tpu.memory_space<vmem>>, vector<31x128xbf16>
    %cst = arith.constant dense<0.000000e+00> : vector<8x128xf32>
    %3 = tpu.matmul %1, %2, %cst {dimension_numbers = #tpu.dot_dimension_numbers<[1], [0], [0], [1], [0, 0, 1, 1], [], []>} : vector<8x31xbf16>, vector<31x128xbf16>, vector<8x128xf32> -> vector<8x128xf32>
    %c0_3 = arith.constant 0 : index
    %c0_4 = arith.constant 0 : index
    %4 = vector.load %arg3[%c0_3, %c0_4] : memref<1x128xf32, #tpu.memory_space<vmem>>, vector<1x128xf32>
    %5 = vector.broadcast %4 : vector<1x128xf32> to vector<8x128xf32>
    %6 = arith.addf %3, %5 : vector<8x128xf32>
    %cst_5 = arith.constant 0.000000e+00 : f32
    %7 = vector.broadcast %cst_5 : f32 to vector<8x128xf32>
    %8 = arith.maximumf %6, %7 : vector<8x128xf32>
    %c0_6 = arith.constant 0 : index
    %c0_7 = arith.constant 0 : index
    %9 = vector.load %arg4[%c0_6, %c0_7] : memref<128x128xf32, #tpu.memory_space<vmem>>, vector<128x128xf32>
    %cst_8 = arith.constant dense<0.000000e+00> : vector<8x128xf32>
    %10 = tpu.matmul %8, %9, %cst_8 {dimension_numbers = #tpu.dot_dimension_numbers<[1], [0], [0], [1], [0, 0, 1, 1], [], []>} : vector<8x128xf32>, vector<128x128xf32>, vector<8x128xf32> -> vector<8x128xf32>
    %c0_9 = arith.constant 0 : index
    %c0_10 = arith.constant 0 : index
    %11 = vector.load %arg5[%c0_9, %c0_10] : memref<1x128xf32, #tpu.memory_space<vmem>>, vector<1x128xf32>
    %12 = vector.broadcast %11 : vector<1x128xf32> to vector<8x128xf32>
    %13 = arith.addf %10, %12 : vector<8x128xf32>
    %c0_11 = arith.constant 0 : index
    %c0_12 = arith.constant 0 : index
    %14 = vector.load %arg6[%c0_11, %c0_12] : memref<8x128xf32, #tpu.memory_space<vmem>>, vector<8x128xf32>
    tpu.vector_store %arg6[%c0_11, %c0_12], %13 {strides = array<i32>} : memref<8x128xf32, #tpu.memory_space<vmem>>, vector<8x128xf32>,
    return
  }
  func.func @transform_0(%arg0: i32) -> (i32, i32) {
    %c0_i32 = arith.constant 0 : i32
    %c0_i32_0 = arith.constant 0 : i32
    return %arg0, %c0_i32 : i32, i32
  }
  func.func @transform_1(%arg0: i32) -> (i32, i32) {
    %c0_i32 = arith.constant 0 : i32
    %c0_i32_0 = arith.constant 0 : i32
    %c0_i32_1 = arith.constant 0 : i32
    return %c0_i32, %c0_i32_0 : i32, i32
  }
  func.func @transform_2(%arg0: i32) -> (i32, i32) {
    %c0_i32 = arith.constant 0 : i32
    %c0_i32_0 = arith.constant 0 : i32
    %c0_i32_1 = arith.constant 0 : i32
    return %c0_i32, %c0_i32_0 : i32, i32
  }
  func.func @transform_3(%arg0: i32) -> (i32, i32) {
    %c0_i32 = arith.constant 0 : i32
    %c0_i32_0 = arith.constant 0 : i32
    %c0_i32_1 = arith.constant 0 : i32
    return %c0_i32, %c0_i32_0 : i32, i32
  }
  func.func @transform_4(%arg0: i32) -> (i32, i32) {
    %c0_i32 = arith.constant 0 : i32
    %c0_i32_0 = arith.constant 0 : i32
    %c0_i32_1 = arith.constant 0 : i32
    return %c0_i32, %c0_i32_0 : i32, i32
  }
  func.func @transform_5(%arg0: i32) -> (i32, i32) {
    %c0_i32 = arith.constant 0 : i32
    %c0_i32_0 = arith.constant 0 : i32
    return %arg0, %c0_i32 : i32, i32
  }
}

</mosaic_0001>

<bundles_post_ra>
// kernel: env_predictor_forward.1
= control target key start
LH: loop header
LB: loop body
LE: loop exit
PB: predicated region body
PF: predicated region fallthrough
CT: control target
= control target key end

     0   :  { %10 = vsyncpa [#allocation3], 0  ;;  %s543_s0 = inlined_call_operand.hbm [shape: f32[8,31], index: 0, kind: input, shape index: {}]   ;;  %s544_s1 = inlined_call_operand.hbm [shape: bf16[31,128], index: 1, kind: input, shape index: {}]   ;;  %s545_s2 = inlined_call_operand.vmem [shape: f32[1,128], index: 2, kind: input, shape index: {}]   ;;  %s546_s3 = inlined_call_operand.hbm [shape: f32[128,128], index: 3, kind: input, shape index: {}]   ;;  %s547_s4 = inlined_call_operand.vmem [shape: f32[1,128], index: 4, kind: input, shape index: {}]   ;;  %s548_s5 = inlined_call_operand.hbm [shape: f32[8,128], index: 5, kind: output, shape index: {}]  }
   0x1   :  { %11 = vsyncpa [#allocation6], 0 }
   0x2   :  { %12 = vsyncpa [#allocation4], 0  ;;  %s447_s18 = smov [#allocation5]   ;;  %s353_s22 = scalar_lea.hbm %s544_s1, 256 }
   0x3   :  { %s28_s19 = sshll.u32 %s447_s18, 4  ;;  %p354_p0 = scmp.ne.s32.totalorder %s544_s1, %s353_s22  ;;  %s29_s19 = int_to_ptr.vmem [resolvable:$true] %s28_s19 }
   0x4   :  { %p357_p1 = scmp.lt.u32.totalorder %s353_s22, %s544_s1 }
   0x6   :  { %p359_p2 = pnand %p357_p1, %p354_p0 }
   0x8   :  { %362 = shalt.err (!%p359_p2)
}
   0x9   :  { %s363_s27 = scalar_lea.vmem %s29_s19, 256  ;;  %p368_p4 = scmp.lt.s32.totalorder %s29_s19, %s29_s19 }
   0xa   :  { %p364_p3 = scmp.ne.s32.totalorder %s29_s19, %s363_s27  ;;  %p369_p5 = scmp.lt.s32.totalorder %s363_s27, %s363_s27 }
   0xc   :  { %p370_p6 = por %p369_p5, %p368_p4 }
   0xe   :  { %p371_p7 = pnand %p370_p6, %p364_p3 }
  0x10   :  { %374 = shalt.err (!%p371_p7)
}
  0x11   :  { %s448_s28 = smov 64   ;;  %s449_s29 = smov 4  }
  0x12   :  { %34 = dma.hbm_to_vmem [thread:$0]  %s544_s1, 256, %s29_s19, [#allocation6], %s448_s28, %s448_s28, %s449_s29  }
  0x13   :  { %s450_s7 = smov [#allocation2]   ;;  %s451_s9 = smov [#allocation7]  }
  0x14   :  { %s19_s8 = sshll.u32 %s450_s7, 4  ;;  %s42_s10 = sshll.u32 %s451_s9, 4  ;;  %s20_s8 = int_to_ptr.vmem [resolvable:$true] %s19_s8  ;;  %s43_s10 = int_to_ptr.vmem [resolvable:$true] %s42_s10 }
  0x15   :  { %s375_s13 = scalar_lea.hbm %s543_s0, 128 }
  0x16   :  { %p376_p8 = scmp.ne.s32.totalorder %s543_s0, %s375_s13  ;;  %p379_p9 = scmp.lt.u32.totalorder %s375_s13, %s543_s0 }
  0x18   :  { %p381_p10 = pnand %p379_p9, %p376_p8 }
  0x1a   :  { %384 = shalt.err (!%p381_p10)
}
  0x1b   :  { %s385_s1 = scalar_lea.vmem %s20_s8, 128  ;;  %p390_p12 = scmp.lt.s32.totalorder %s20_s8, %s20_s8 }
  0x1c   :  { %p386_p11 = scmp.ne.s32.totalorder %s20_s8, %s385_s1  ;;  %p391_p13 = scmp.lt.s32.totalorder %s385_s1, %s385_s1 }
  0x1e   :  { %p392_p0 = por %p391_p13, %p390_p12 }
  0x20   :  { %p393_p1 = pnand %p392_p0, %p386_p11 }
  0x22   :  { %396 = shalt.err (!%p393_p1)
}
  0x23   :  { %22 = dma.hbm_to_vmem [thread:$0]  %s543_s0, 128, %s20_s8, [#allocation3]  }
  0x24   :  { %s397_s22 = scalar_lea.hbm %s546_s3, 2048 }
  0x25   :  { %p398_p2 = scmp.ne.s32.totalorder %s546_s3, %s397_s22  ;;  %p401_p3 = scmp.lt.u32.totalorder %s397_s22, %s546_s3 }
  0x27   :  { %p403_p4 = pnand %p401_p3, %p398_p2 }
  0x29   :  { %406 = shalt.err (!%p403_p4)
}
  0x2a   :  { %s407_s27 = scalar_lea.vmem %s43_s10, 2048  ;;  %p412_p6 = scmp.lt.s32.totalorder %s43_s10, %s43_s10 }
  0x2b   :  { %p408_p5 = scmp.ne.s32.totalorder %s43_s10, %s407_s27  ;;  %p413_p7 = scmp.lt.s32.totalorder %s407_s27, %s407_s27 }
  0x2d   :  { %p414_p8 = por %p413_p7, %p412_p6 }
  0x2f   :  { %p415_p9 = pnand %p414_p8, %p408_p5 }
  0x31   :  { %418 = shalt.err (!%p415_p9)
}
  0x32   :  { %s452_s0 = smov 128   ;;  %s453_s28 = smov 8  }
  0x33   :  { %48 = dma.hbm_to_vmem [thread:$0]  %s546_s3, 2048, %s43_s10, [#allocation6], %s452_s0, %s452_s0, %s453_s28  }
  0x34   :  { %441 = dma.done.wait [#allocation3], 128  }
  0x35   :  { %442 = vsyncadd [#allocation3], 4294967168 }
  0x36   :  { %443 = dma.done.wait [#allocation6], 2304  }
  0x37   :  { %444 = vsyncadd [#allocation6], 4294964992  ;;  %v454_v0 = vmov 0.0   ;;  %vm89_vm0 = vcmask 1046528   ;;  %vm455_vm1 = vmmov 0   ;;  %v456_v1 = vmov 0.0|0.0  }
  0x38   :  { %272 = vmatprep.subr.bf16.mxu0 %v454_v0  ;;  %276 = vmatprep.mubr.msk.bf16.mxu0 %vm455_vm1, %v454_v0  ;;  %vm90_vm2 = vcmask 1047552   ;;  %v457_v2 = vmov 65535   ;;  %v351_v4 = vld [vmem:[#allocation5] sm:$0xff]   ;;  %v352_v6 = vld [vmem:[#allocation5 + $0x8] sm:$0xff]   ;;  %v61_v7 = vld [vmem:[#allocation2] sm:$0xff]  ;;  %vm85_vm3 = vcmask 252928  }
  0x39   :  { %315 = vmatprep.subr.bf16.mxu1 %v456_v1  ;;  %312 = vmatprep.mubr.msk.f32.mxu1 %vm455_vm1, %v454_v0  ;;  %v91_v3 = vsel %vm89_vm0, 4294967295, %v457_v2  ;;  %v137_v8 = vld [vmem:[#allocation7] sm:$0xff]  ;;  %v138_v9 = vld [vmem:[#allocation7 + $0x8] sm:$0xff]  ;;  %v139_v12 = vld [vmem:[#allocation7 + $0x10] sm:$0xff]  ;;  %v62_v14 = vpack.c.bf16 %v61_v7, %v61_v7  ;;  %s458_s9 = smov [#allocation8]  }
  0x3a   :  { %v92_v5 = vsel %vm90_vm2, %v91_v3, 0  ;;  %273 = vmatpush3.bf16.msra.mxu0 %v351_v4  ;;  %v316_v11 = vpack.c.bf16 %v138_v9, %v137_v8  ;;  %v140_v13 = vld [vmem:[#allocation7 + $0x18] sm:$0xff]  ;;  %v141_v16 = vld [vmem:[#allocation7 + $0x20] sm:$0xff]  ;;  %v142_v17 = vld [vmem:[#allocation7 + $0x28] sm:$0xff]  ;;  %s237_s10 = sshll.u32 %s458_s9, 4  ;;  %s238_s10 = int_to_ptr.vmem [resolvable:$true] %s237_s10 }
  0x3b   :  { %274 = vmatprep.subr.bf16.mxu0 %v454_v0  ;;  %v94_v10 = vand.u32 %v352_v6, %v92_v5  ;;  %v319_v15 = vpack.c.bf16 %v140_v13, %v139_v12  ;;  %v322_v18 = vpack.c.bf16 %v142_v17, %v141_v16  ;;  %v143_v19 = vld [vmem:[#allocation7 + $0x30] sm:$0xff]  ;;  %v144_v20 = vld [vmem:[#allocation7 + $0x38] sm:$0xff]  ;;  %v145_v22 = vld [vmem:[#allocation7 + $0x40] sm:$0xff]  ;;  %s419_s11 = scalar_lea.vmem %s238_s10, 128  ;;  %p424_p11 = scmp.lt.s32.totalorder %s238_s10, %s238_s10 }
  0x3c   :  { %317 = vmatpush3.bf16.msra.mxu1 %v316_v11  ;;  %v325_v21 = vpack.c.bf16 %v144_v20, %v143_v19  ;;  %v146_v23 = vld [vmem:[#allocation7 + $0x48] sm:$0xff]  ;;  %v147_v25 = vld [vmem:[#allocation7 + $0x50] sm:$0xff]  ;;  %v148_v26 = vld [vmem:[#allocation7 + $0x58] sm:$0xff]  ;;  %p420_p10 = scmp.ne.s32.totalorder %s238_s10, %s419_s11  ;;  %p425_p12 = scmp.lt.s32.totalorder %s419_s11, %s419_s11 }
  0x3d   :  { %318 = vmatprep.subr.bf16.mxu1 %v456_v1  ;;  %v328_v24 = vpack.c.bf16 %v146_v23, %v145_v22  ;;  %v331_v27 = vpack.c.bf16 %v148_v26, %v147_v25  ;;  %v149_v28 = vld [vmem:[#allocation7 + $0x60] sm:$0xff]  ;;  %v150_v29 = vld [vmem:[#allocation7 + $0x68] sm:$0xff]  ;;  %v151_v31 = vld [vmem:[#allocation7 + $0x70] sm:$0xff] }
  0x3e   :  { %275 = vmatpush3.bf16.msra.mxu0 %v94_v10  ;;  %v334_v30 = vpack.c.bf16 %v150_v29, %v149_v28  ;;  %v152_v32 = vld [vmem:[#allocation7 + $0x78] sm:$0xff]  ;;  %v247_v34 = vld [vmem:[%s545_s2] ss:$0 sm:$0xff]  ;;  %p426_p13 = por %p425_p12, %p424_p11 }
  0x3f   :  { %v337_v33 = vpack.c.bf16 %v152_v32, %v151_v31  ;;  %v251_v41 = vld [vmem:[%s547_s4] ss:$0 sm:$0xff] }
  0x40   :  { %320 = vmatpush3.bf16.msra.mxu1 %v319_v15  ;;  %p427_p0 = pnand %p426_p13, %p420_p10 }
  0x41   :  { %277 = vmatmul.mubr.msk.bf16.vlgmr.msra.gmra.mrb[0].mxu0 %vm85_vm3, %v62_v14  ;;  %321 = vmatprep.subr.bf16.mxu1 %v456_v1 }
  0x44   :  { %323 = vmatpush3.bf16.msra.mxu1 %v322_v18 }
  0x45   :  { %324 = vmatprep.subr.bf16.mxu1 %v456_v1 }
  0x48   :  { %326 = vmatpush3.bf16.msra.mxu1 %v325_v21 }
  0x49   :  { %327 = vmatprep.subr.bf16.mxu1 %v456_v1 }
  0x4c   :  { %329 = vmatpush3.bf16.msra.mxu1 %v328_v24 }
  0x4d   :  { %330 = vmatprep.subr.bf16.mxu1 %v456_v1 }
  0x50   :  { %332 = vmatpush3.bf16.msra.mxu1 %v331_v27 }
  0x51   :  { %333 = vmatprep.subr.bf16.mxu1 %v456_v1 }
  0x54   :  { %335 = vmatpush3.bf16.msra.mxu1 %v334_v30 }
  0x55   :  { %336 = vmatprep.subr.bf16.mxu1 %v456_v1 }
  0x58   :  { %338 = vmatpush3.bf16.msra.mxu1 %v337_v33 }
 0x114   :  { %v130_v35 = vpop.f32.mrb[0].mxu0 }
 0x115   :  { %v131_v36 = vadd.f32 %v247_v34, %v130_v35  ;;  %v278_v37 = vpop.f32.mrb[1].mxu0 }
 0x116   :  { %v133_v38 = vpop.f32.mrb[2].mxu0 }
 0x117   :  { %v136_v39 = vmax.f32 %v131_v36, 0.0  ;;  %v279_v40 = vpop.f32.mrb[3].mxu0 }
 0x119   :  { %313 = vmatmul.mubr.f32.vlgmr.msra.gmra.mrb[0].mxu1 %v136_v39 }
 0x1ec   :  { %v226_v42 = vpop.f32.mrb[0].mxu1 }
 0x1ed   :  { %v227_v43 = vadd.f32 %v251_v41, %v226_v42  ;;  %v314_v44 = vpop.f32.mrb[1].mxu1 }
 0x1ef   :  { %230 = vst [vmem:[#allocation8] sm:$0xff] %v227_v43 }
 0x1f0   :  { %430 = shalt.err (!%p427_p0)
}
 0x1f1   :  { %s431_s13 = scalar_lea.hbm %s548_s5, 128 }
 0x1f2   :  { %p432_p1 = scmp.ne.s32.totalorder %s548_s5, %s431_s13  ;;  %p435_p2 = scmp.lt.u32.totalorder %s431_s13, %s548_s5 }
 0x1f4   :  { %p437_p3 = pnand %p435_p2, %p432_p1 }
 0x1f6   :  { %440 = shalt.err (!%p437_p3)
}
 0x1f7   :  { %240 = dma.vmem_to_hbm [thread:$0]  %s238_s10, 128, %s548_s5, [#allocation4]  }
 0x1f8   :  { %445 = dma.done.wait [#allocation4], 128  }
 0x1f9   :  { %446 = vsyncadd [#allocation4], 4294967168 }
 0x1fa   :  { %244 = vsyncpa [#allocation3], 1 }
 0x1fb   :  { %245 = vsyncpa [#allocation6], 1 }
 0x1fc   :  { %246 = vsyncpa [#allocation4], 1 }

</bundles_post_ra>
